<compile_context>
chip_gen: v6e
topology: v6e:2x2x1
jax: 0.10.0
libtpu: 0.0.40
codegen_flags: <defaults>
</compile_context>

<pallas_src>
import numpy as np
import jax
import jax.numpy as jnp
from jax.experimental import pallas as pl
from jax.experimental.pallas import tpu as pltpu


_LANE = 128
_MAX_LANES = 1024                       # lane-dense block width cap (mult of 128)
_MAX_BLOCK_BYTES = 2 * 1024 * 1024      # per-buffer block cap (~2 MiB)


def _lambda_copy_kernel(x_ref, o_ref):
    # Identity copy of the current lane-dense tile (the data movement a
    # materialized .view()/.reshape() implies).
    o_ref[...] = x_ref[...]


def _resolve_shape(total, new_shape):
    """Resolve a torch-style shape (possibly containing one -1)."""
    new_shape = tuple(int(d) for d in new_shape)
    if -1 in new_shape:
        i = new_shape.index(-1)
        known = int(np.prod([d for d in new_shape if d != -1], dtype=np.int64))
        new_shape = new_shape[:i] + (total // known,) + new_shape[i + 1:]
    assert int(np.prod(new_shape, dtype=np.int64)) == total, (new_shape, total)
    return new_shape


def _choose_slab(total):
    """Fold `total` elements into a lane-dense (rows, lanes) slab.

    lanes is the largest power-of-two multiple of 128 (capped) that divides
    `total` while keeping rows >= 8 when possible, so blocks occupy full
    (8, 128) vregs even for tiny batch sizes.
    """
    if total % _LANE != 0:
        return None
    lanes = _LANE
    while (lanes * 2 <= _MAX_LANES
           and total % (lanes * 2) == 0
           and total // (lanes * 2) >= 8):
        lanes *= 2
    return total // lanes, lanes


def _choose_block_rows(rows, lanes, itemsize):
    """Pick a block row count: large, VMEM-bounded, sublane-granule aligned."""
    max_rows_by_vmem = max(8, _MAX_BLOCK_BYTES // (lanes * itemsize))
    cap = min(512, max_rows_by_vmem)
    if rows <= cap:
        return rows                      # one full-height block (full dim OK)
    granule = 8 * max(1, 4 // itemsize)  # 8 (f32) / 16 (bf16) / 32 (int8)
    return max(granule, (cap // granule) * granule)


def _pallas_materialize_2d(x2):
    """Copy a lane-dense (rows, lanes) slab through VMEM with large blocks."""
    rows, lanes = x2.shape
    itemsize = jnp.dtype(x2.dtype).itemsize
    block_rows = _choose_block_rows(rows, lanes, itemsize)
    grid = (pl.cdiv(rows, block_rows),)
    return pl.pallas_call(
        _lambda_copy_kernel,
        out_shape=jax.ShapeDtypeStruct((rows, lanes), x2.dtype),
        grid=grid,
        in_specs=[pl.BlockSpec((block_rows, lanes), lambda i: (i, 0))],
        out_specs=pl.BlockSpec((block_rows, lanes), lambda i: (i, 0)),
        # Allow XLA to alias/donate the buffer under jit: the "copy" then
        # costs no extra HBM allocation (and no traffic when donated).
        input_output_aliases={0: 0},
        compiler_params=pltpu.CompilerParams(
            dimension_semantics=("parallel",),      # megacore split on v7x
            vmem_limit_bytes=32 * 1024 * 1024),     # safe on v5e/v6e/v7x
    )(x2)


def pallas_view(x, new_shape):
    """Equivalent of torch.Tensor.view(new_shape).

    The reshape itself is metadata; the Pallas kernel materializes the output
    buffer with one lane-dense tiled pass.
    """
    total = int(np.prod(x.shape, dtype=np.int64))
    target = _resolve_shape(total, new_shape)
    slab = _choose_slab(total)
    if slab is None:
        # TODO(synk): element count not a multiple of 128 — a view is pure
        # metadata, so skip the copy kernel entirely (top perf recommendation)
        # rather than emit a masked / single-block degenerate copy.
        return jnp.reshape(x, target)
    rows, lanes = slab
    x2 = jnp.reshape(x, (rows, lanes))       # metadata: lane-dense slab
    out2 = _pallas_materialize_2d(x2)        # one HBM pass, full-width stores
    return jnp.reshape(out2, target)         # metadata: requested view


def pallas_flatten(x):
    """Equivalent of the tutorial's Lambda(lambda x: x.view(x.size(0), -1))."""
    return pallas_view(x, (x.shape[0], -1))


class Lambda:
    """JAX/Pallas port of the PyTorch Lambda module: forward(x) = func(x)."""

    def __init__(self, func):
        self.func = func

    def __call__(self, x):
        return self.func(x)


if __name__ == "__main__":
    key = jax.random.PRNGKey(0)
    # Small NCHW input consistent with the tutorial's conv pipeline usage.
    x = jax.random.normal(key, (2, 4, 16, 16), dtype=jnp.float32)

    # Lambda #1: flatten, as used right before the final loss in the tutorial.
    flatten = Lambda(pallas_flatten)
    out_flat = jax.block_until_ready(flatten(x))

    # Lambda #2: "preprocess"-style view back to (N, 1, H', W').
    preprocess = Lambda(lambda t: pallas_view(t, (-1, 1, 16, 16)))
    out_pre = jax.block_until_ready(preprocess(out_flat))

    # Reference semantics (pure JAX reshapes).
    ref_flat = x.reshape(x.shape[0], -1)
    ref_pre = ref_flat.reshape(-1, 1, 16, 16)

    assert out_flat.shape == (2, 4 * 16 * 16), out_flat.shape
    assert out_pre.shape == (2 * 4, 1, 16, 16), out_pre.shape
    assert out_flat.dtype == x.dtype and out_pre.dtype == x.dtype
    np.testing.assert_allclose(np.asarray(out_flat), np.asarray(ref_flat))
    np.testing.assert_allclose(np.asarray(out_pre), np.asarray(ref_pre))

    print("KERNEL_OK")
</pallas_src>

<mosaic_0001>
module attributes {stable_mosaic.version = 11 : i64} {
  func.func @_lambda_copy_kernel(%arg0: i32, %arg1: memref<8x256xf32, #tpu.memory_space<vmem>>, %arg2: memref<8x256xf32, #tpu.memory_space<vmem>>) attributes {dimension_semantics = [#tpu.dimension_semantics<parallel>], iteration_bounds = array<i64: 1>, scalar_prefetch = 0 : i64, scratch_operands = 0 : i64, tpu.core_type = #tpu.core_type<tc>, window_params = [{transform_indices = @transform_0, window_bounds = array<i64: 8, 256>}, {transform_indices = @transform_1, window_bounds = array<i64: 8, 256>}]} {
    %c0 = arith.constant 0 : index
    %c0_0 = arith.constant 0 : index
    %0 = vector.load %arg1[%c0, %c0_0] : memref<8x256xf32, #tpu.memory_space<vmem>>, vector<8x256xf32>
    %c0_1 = arith.constant 0 : index
    %c0_2 = arith.constant 0 : index
    %1 = vector.load %arg2[%c0_1, %c0_2] : memref<8x256xf32, #tpu.memory_space<vmem>>, vector<8x256xf32>
    tpu.vector_store %arg2[%c0_1, %c0_2], %0 {strides = array<i32>} : memref<8x256xf32, #tpu.memory_space<vmem>>, vector<8x256xf32>,
    return
  }
  func.func @transform_0(%arg0: i32) -> (i32, i32) {
    %c0_i32 = arith.constant 0 : i32
    %c0_i32_0 = arith.constant 0 : i32
    return %arg0, %c0_i32 : i32, i32
  }
  func.func @transform_1(%arg0: i32) -> (i32, i32) {
    %c0_i32 = arith.constant 0 : i32
    %c0_i32_0 = arith.constant 0 : i32
    return %arg0, %c0_i32 : i32, i32
  }
}

</mosaic_0001>

<bundles_post_ra>
// kernel: tpu_custom_call.1
= control target key start
LH: loop header
LB: loop body
LE: loop exit
PB: predicated region body
PF: predicated region fallthrough
CT: control target
= control target key end

     0   :  { %6 = vsyncpa [#allocation3], 0  ;;  %s104_s0 = inlined_call_operand.hbm [shape: f32[8,256], index: 0, kind: input, shape index: {}, may-alias: {0,1}]   ;;  %s105_s1 = inlined_call_operand.hbm [shape: f32[8,256], index: 1, kind: output, shape index: {}, may-alias: {0,1}]  }
   0x1   :  { %7 = vsyncpa [#allocation4], 0  ;;  %s86_s6 = smov [#allocation2]  }
   0x2   :  { %s14_s7 = sshll.u32 %s86_s6, 4  ;;  %s15_s7 = int_to_ptr.vmem [resolvable:$true] %s14_s7 }
   0x3   :  { %s50_s8 = scalar_lea.vmem %s15_s7, 256  ;;  %p55_p1 = scmp.lt.s32.totalorder %s15_s7, %s15_s7 }
   0x4   :  { %p51_p0 = scmp.ne.s32.totalorder %s15_s7, %s50_s8  ;;  %p56_p2 = scmp.lt.s32.totalorder %s50_s8, %s50_s8 }
   0x6   :  { %p57_p3 = por %p56_p2, %p55_p1 }
   0x8   :  { %p58_p4 = pnand %p57_p3, %p51_p0 }
   0xa   :  { %61 = shalt.err (!%p58_p4)
}
   0xb   :  { %17 = dma.hbm_to_vmem [thread:$0]  %s104_s0, 256, %s15_s7, [#allocation3]  }
   0xc   :  { %82 = dma.done.wait [#allocation3], 256  }
   0xd   :  { %83 = vsyncadd [#allocation3], 4294967040  ;;  %s87_s11 = smov [#allocation5]   ;;  %v21_v0 = vld [vmem:[#allocation2] sm:$0xff]  ;;  %v22_v1 = vld [vmem:[#allocation2 + $0x8] sm:$0xff] }
   0xe   :  { %s31_s12 = sshll.u32 %s87_s11, 4  ;;  %23 = vst [vmem:[#allocation5] sm:$0xff] %v21_v0  ;;  %24 = vst [vmem:[#allocation5 + $0x8] sm:$0xff] %v22_v1  ;;  %s32_s12 = int_to_ptr.vmem [resolvable:$true] %s31_s12 }
   0xf   :  { %s62_s13 = scalar_lea.vmem %s32_s12, 256  ;;  %p67_p6 = scmp.lt.s32.totalorder %s32_s12, %s32_s12 }
  0x10   :  { %p63_p5 = scmp.ne.s32.totalorder %s32_s12, %s62_s13  ;;  %p68_p7 = scmp.lt.s32.totalorder %s62_s13, %s62_s13 }
  0x12   :  { %p69_p8 = por %p68_p7, %p67_p6 }
  0x14   :  { %p70_p9 = pnand %p69_p8, %p63_p5 }
  0x16   :  { %73 = shalt.err (!%p70_p9)
}
  0x17   :  { %34 = dma.vmem_to_hbm [thread:$0]  %s32_s12, 256, %s105_s1, [#allocation4]  }
  0x18   :  { %84 = dma.done.wait [#allocation4], 256  }
  0x19   :  { %85 = vsyncadd [#allocation4], 4294967040 }
  0x1a   :  { %38 = vsyncpa [#allocation3], 1 }
  0x1b   :  { %39 = vsyncpa [#allocation4], 1 }

</bundles_post_ra>
